<compile_context>
chip_gen: v7x
topology: tpu7x:2x2x1
jax: 0.10.0
libtpu: 0.0.40
codegen_flags: <defaults>
</compile_context>

<pallas_src>
import functools
import math

import jax
import jax.numpy as jnp
from jax import lax
from jax.experimental import pallas as pl
from jax.experimental.pallas import tpu as pltpu


def _round_up(x, m):
    return (x + m - 1) // m * m


def _mlp_kernel(x_ref, w1_ref, b1_ref, w2_ref, b2_ref, w3_ref, b3_ref, o_ref,
                *, chunk):
    """Eval-mode forward in [feature, batch] orientation.

    x_ref  : (TB, n_in)   streamed batch tile (ragged tail rows are garbage)
    w1_ref : (h1, n_in)   PyTorch nn.Linear layout [out, in]
    b1_ref : (h1, 1)
    w2_ref : (h2, h1)
    b2_ref : (h2, 1)
    w3_ref : (h2, 1)      layer-3 weight as a column (VPU multiply + reduce)
    b3_ref : (1, 1)       SMEM scalar
    o_ref  : (1, TB)      batch on the lane axis (lane-dense stores)
    """
    w1 = w1_ref[...]
    b1 = b1_ref[...]
    w2 = w2_ref[...]
    b2 = b2_ref[...]
    w3 = w3_ref[...]
    b3 = b3_ref[0, 0]

    n_chunks = o_ref.shape[1] // chunk      # static: TB % chunk == 0

    def body(c, carry):
        start = pl.multiple_of(c * chunk, chunk)
        xs = x_ref[pl.ds(start, chunk), :].astype(w1.dtype)      # (chunk, n_in)

        # layer 1: [h1, chunk] = w1 @ xs^T (contract the n_in axes; the MXU
        # consumes the transposed rhs directly, no VMEM relayout).
        h1 = lax.dot_general(w1, xs, (((1,), (1,)), ((), ())),
                             preferred_element_type=jnp.float32)
        h1 = jnp.maximum(h1 + b1, 0.0)            # bias+ReLU, batch on lanes
        # (dropout == identity in eval mode)

        # layer 2: [h2, chunk] = w2 @ h1
        h2 = lax.dot_general(w2, h1.astype(w2.dtype), (((1,), (0,)), ((), ())),
                             preferred_element_type=jnp.float32)
        h2 = jnp.maximum(h2 + b2, 0.0)

        # layer 3 (out_features == 1): VPU multiply + sublane reduction; no
        # cross-lane work, result is already (1, chunk) lane-dense.
        out = jnp.sum(h2 * w3, axis=0, keepdims=True) + b3
        o_ref[:, pl.ds(start, chunk)] = out.astype(o_ref.dtype)
        return carry

    lax.fori_loop(0, n_chunks, body, 0, unroll=True)


def _vmem_block_bytes(shape, dtype):
    # (sublane, lane) padding of a VMEM block: second-to-last -> 8, last -> 128.
    r = _round_up(shape[-2], 8) if len(shape) >= 2 else 1
    c = _round_up(shape[-1], 128)
    return r * c * jnp.dtype(dtype).itemsize


@functools.partial(jax.jit, static_argnames=("block_rows",))
def horno_forward(x, params, *, block_rows=4096):
    """Eval-mode HornoModel forward. x: [B, n_input] -> [B, 1] f32."""
    w1, b1 = params["w1"], params["b1"]
    w2, b2 = params["w2"], params["b2"]
    w3, b3 = params["w3"], params["b3"]

    B, n_in = x.shape
    h1_dim = w1.shape[0]
    h2_dim = w2.shape[0]

    # ---- batch tile selection --------------------------------------------
    # Multiple of 128 (lane-aligned output stores / sublane-aligned x loads).
    tb = _round_up(min(block_rows, max(B, 1)), 128)
    # v7x: keep >=2 grid steps so the "parallel" batch axis shards across both
    # TensorCores (no-op on v5e / v6e, which have 1 TC per chip).
    if B >= 256:
        tb = min(tb, _round_up(-(-B // 2), 128))
    # Keep the double-buffered, lane-padded x block within a conservative
    # budget (v5e default scoped VMEM is 16 MiB; n_in pads to a 128 multiple).
    x_row_bytes = _round_up(n_in, 128) * x.dtype.itemsize
    tb_cap = max(128, ((8 << 20) // (2 * x_row_bytes)) // 128 * 128)
    tb = min(tb, tb_cap)

    num_tiles = pl.cdiv(B, tb)            # ragged tail block is masked by Pallas
    # Inner sub-chunk (lanes) so [h, chunk] intermediates stay small.
    chunk = math.gcd(tb, 512)

    flops = 2 * B * (n_in * h1_dim + h1_dim * h2_dim + h2_dim)
    bytes_accessed = (
        x.size * x.dtype.itemsize
        + B * 4
        + sum(int(p.size) * p.dtype.itemsize for p in (w1, b1, w2, b2, w3, b3))
    )

    vmem_bytes = (
        2 * _vmem_block_bytes((tb, n_in), x.dtype)          # x (double-buffered)
        + 2 * _vmem_block_bytes((1, tb), jnp.float32)       # out (double-buffered)
        + 2 * sum(_vmem_block_bytes(p.shape, p.dtype)       # resident weights
                  for p in (w1, b1, w2, b2, w3))
    )
    vmem_limit = int(min(max(2 * vmem_bytes + (2 << 20), 16 << 20), 64 << 20))

    out = pl.pallas_call(
        functools.partial(_mlp_kernel, chunk=chunk),
        out_shape=jax.ShapeDtypeStruct((1, B), jnp.float32),
        grid=(num_tiles,),
        in_specs=[
            pl.BlockSpec((tb, n_in), lambda i: (i, 0)),          # x: streamed
            pl.BlockSpec((h1_dim, n_in), lambda i: (0, 0)),      # weights resident
            pl.BlockSpec((h1_dim, 1), lambda i: (0, 0)),
            pl.BlockSpec((h2_dim, h1_dim), lambda i: (0, 0)),
            pl.BlockSpec((h2_dim, 1), lambda i: (0, 0)),
            pl.BlockSpec((h2_dim, 1), lambda i: (0, 0)),
            pl.BlockSpec(memory_space=pltpu.MemorySpace.SMEM),   # b3 scalar
        ],
        out_specs=pl.BlockSpec((1, tb), lambda i: (0, i)),       # lane-dense slices
        compiler_params=pltpu.CompilerParams(
            dimension_semantics=("parallel",),
            vmem_limit_bytes=vmem_limit),
        cost_estimate=pl.CostEstimate(
            flops=flops, transcendentals=0, bytes_accessed=bytes_accessed),
    )(x, w1, b1, w2, b2, w3, b3)

    return out.reshape(B, 1)


def init_params(key, n_input, n_hidden_1, n_hidden_2, *, dtype=jnp.float32):
    """nn.Linear-style init: U(-1/sqrt(fan_in), +1/sqrt(fan_in)).

    Weights are kept in the PyTorch [out, in] layout (f32 by default for parity
    with the reference model); biases as [out, 1] columns for the transposed
    in-kernel orientation; w3 as an [h2, 1] column, b3 as a (1, 1) scalar."""
    ks = jax.random.split(key, 6)

    def lin(kw, kb, fan_in, fan_out):
        bound = 1.0 / float(fan_in) ** 0.5
        w = jax.random.uniform(kw, (fan_out, fan_in), jnp.float32, -bound, bound)
        b = jax.random.uniform(kb, (fan_out, 1), jnp.float32, -bound, bound)
        return w.astype(dtype), b

    w1, b1 = lin(ks[0], ks[1], n_input, n_hidden_1)
    w2, b2 = lin(ks[2], ks[3], n_hidden_1, n_hidden_2)
    w3r, b3 = lin(ks[4], ks[5], n_hidden_2, 1)
    return {"w1": w1, "b1": b1, "w2": w2, "b2": b2,
            "w3": w3r.reshape(n_hidden_2, 1).astype(jnp.float32),
            "b3": b3.reshape(1, 1)}


if __name__ == "__main__":
    key = jax.random.PRNGKey(0)
    k_x, k_p = jax.random.split(key)

    # Small shapes; batch=300 exercises multiple grid steps plus a ragged tail
    # tile (no host-side padding).  block_rows=128 only for this tiny test;
    # the production default is 4096.
    batch, n_input, n_hidden_1, n_hidden_2 = 300, 16, 32, 32
    x = jax.random.normal(k_x, (batch, n_input), jnp.float32)
    params = init_params(k_p, n_input, n_hidden_1, n_hidden_2)

    out = horno_forward(x, params, block_rows=128)
    jax.block_until_ready(out)

    # Plain-JAX f32 reference (eval mode: dropout == identity).
    r1 = jnp.maximum(x @ params["w1"].T + params["b1"].T, 0.0)
    r2 = jnp.maximum(r1 @ params["w2"].T + params["b2"].T, 0.0)
    ref = r2 @ params["w3"] + params["b3"]

    assert out.shape == (batch, 1)
    # Tolerance covers possible differences between the Mosaic MXU f32 matmul
    # path and XLA's default f32 dot precision on TPU.
    err = float(jnp.max(jnp.abs(out - ref)))
    assert jnp.allclose(out, ref, atol=1e-2, rtol=1e-2), err

    print("KERNEL_OK")
</pallas_src>

<mosaic_0001>
module attributes {stable_mosaic.version = 11 : i64} {
  func.func @_mlp_kernel(%arg0: i32, %arg1: memref<128x16xf32, #tpu.memory_space<vmem>>, %arg2: memref<32x16xf32, #tpu.memory_space<vmem>>, %arg3: memref<32x1xf32, #tpu.memory_space<vmem>>, %arg4: memref<32x32xf32, #tpu.memory_space<vmem>>, %arg5: memref<32x1xf32, #tpu.memory_space<vmem>>, %arg6: memref<32x1xf32, #tpu.memory_space<vmem>>, %arg7: memref<1x1xf32, #tpu.memory_space<smem>>, %arg8: memref<1x128xf32, #tpu.memory_space<vmem>>) attributes {dimension_semantics = [#tpu.dimension_semantics<parallel>], iteration_bounds = array<i64: 3>, scalar_prefetch = 0 : i64, scratch_operands = 0 : i64, tpu.core_type = #tpu.core_type<tc>, window_params = [{transform_indices = @transform_0, window_bounds = array<i64: 128, 16>}, {pipeline_mode = #tpu.pipeline_mode<synchronous>, transform_indices = @transform_1, window_bounds = array<i64: 32, 16>}, {pipeline_mode = #tpu.pipeline_mode<synchronous>, transform_indices = @transform_2, window_bounds = array<i64: 32, 1>}, {pipeline_mode = #tpu.pipeline_mode<synchronous>, transform_indices = @transform_3, window_bounds = array<i64: 32, 32>}, {pipeline_mode = #tpu.pipeline_mode<synchronous>, transform_indices = @transform_4, window_bounds = array<i64: 32, 1>}, {pipeline_mode = #tpu.pipeline_mode<synchronous>, transform_indices = @transform_5, window_bounds = array<i64: 32, 1>}, {transform_indices = @transform_6, window_bounds = array<i64: 1, 1>}, {transform_indices = @transform_7, window_bounds = array<i64: 1, 128>}]} {
    %c0 = arith.constant 0 : index
    %c0_0 = arith.constant 0 : index
    %0 = vector.load %arg2[%c0, %c0_0] : memref<32x16xf32, #tpu.memory_space<vmem>>, vector<32x16xf32>
    %c0_1 = arith.constant 0 : index
    %c0_2 = arith.constant 0 : index
    %1 = vector.load %arg3[%c0_1, %c0_2] : memref<32x1xf32, #tpu.memory_space<vmem>>, vector<32x1xf32>
    %c0_3 = arith.constant 0 : index
    %c0_4 = arith.constant 0 : index
    %2 = vector.load %arg4[%c0_3, %c0_4] : memref<32x32xf32, #tpu.memory_space<vmem>>, vector<32x32xf32>
    %c0_5 = arith.constant 0 : index
    %c0_6 = arith.constant 0 : index
    %3 = vector.load %arg5[%c0_5, %c0_6] : memref<32x1xf32, #tpu.memory_space<vmem>>, vector<32x1xf32>
    %c0_7 = arith.constant 0 : index
    %c0_8 = arith.constant 0 : index
    %4 = vector.load %arg6[%c0_7, %c0_8] : memref<32x1xf32, #tpu.memory_space<vmem>>, vector<32x1xf32>
    %c0_9 = arith.constant 0 : index
    %c0_10 = arith.constant 0 : index
    %5 = memref.load %arg7[%c0_9, %c0_10] : memref<1x1xf32, #tpu.memory_space<smem>>
    %c0_i32 = arith.constant 0 : i32
    %c128_i32 = arith.constant 128 : i32
    %6 = arith.muli %c0_i32, %c128_i32 : i32
    %7 = tpu.assume_multiple %6, 128 : i32
    %8 = arith.index_cast %7 : i32 to index
    %c0_11 = arith.constant 0 : index
    %9 = vector.load %arg1[%8, %c0_11] : memref<128x16xf32, #tpu.memory_space<vmem>>, vector<128x16xf32>
    %cst = arith.constant dense<0.000000e+00> : vector<32x128xf32>
    %10 = tpu.matmul %0, %9, %cst {dimension_numbers = #tpu.dot_dimension_numbers<[1], [1], [0], [0], [0, 0, 1, 0], [], []>} : vector<32x16xf32>, vector<128x16xf32>, vector<32x128xf32> -> vector<32x128xf32>
    %11 = vector.broadcast %1 : vector<32x1xf32> to vector<32x128xf32>
    %12 = arith.addf %10, %11 : vector<32x128xf32>
    %cst_12 = arith.constant 0.000000e+00 : f32
    %13 = vector.broadcast %cst_12 : f32 to vector<32x128xf32>
    %14 = arith.maximumf %12, %13 : vector<32x128xf32>
    %cst_13 = arith.constant dense<0.000000e+00> : vector<32x128xf32>
    %15 = tpu.matmul %2, %14, %cst_13 {dimension_numbers = #tpu.dot_dimension_numbers<[1], [0], [0], [1], [0, 0, 1, 1], [], []>} : vector<32x32xf32>, vector<32x128xf32>, vector<32x128xf32> -> vector<32x128xf32>
    %16 = vector.broadcast %3 : vector<32x1xf32> to vector<32x128xf32>
    %17 = arith.addf %15, %16 : vector<32x128xf32>
    %cst_14 = arith.constant 0.000000e+00 : f32
    %18 = vector.broadcast %cst_14 : f32 to vector<32x128xf32>
    %19 = arith.maximumf %17, %18 : vector<32x128xf32>
    %20 = vector.broadcast %4 : vector<32x1xf32> to vector<32x128xf32>
    %21 = arith.mulf %19, %20 : vector<32x128xf32>
    %cst_15 = arith.constant dense<0.000000e+00> : vector<128xf32>
    %22 = vector.multi_reduction <add>, %21, %cst_15 [0] : vector<32x128xf32> to vector<128xf32>
    %23 = vector.shape_cast %22 : vector<128xf32> to vector<1x128xf32>
    %24 = vector.broadcast %5 : f32 to vector<1x128xf32>
    %25 = arith.addf %23, %24 : vector<1x128xf32>
    %c0_16 = arith.constant 0 : index
    %26 = arith.index_cast %7 : i32 to index
    %27 = vector.load %arg8[%c0_16, %26] : memref<1x128xf32, #tpu.memory_space<vmem>>, vector<1x128xf32>
    tpu.vector_store %arg8[%c0_16, %26], %25 {strides = array<i32>} : memref<1x128xf32, #tpu.memory_space<vmem>>, vector<1x128xf32>,
    %c1_i32 = arith.constant 1 : i32
    return
  }
  func.func @transform_0(%arg0: i32) -> (i32, i32) {
    %c0_i32 = arith.constant 0 : i32
    %c0_i32_0 = arith.constant 0 : i32
    return %arg0, %c0_i32 : i32, i32
  }
  func.func @transform_1(%arg0: i32) -> (i32, i32) {
    %c0_i32 = arith.constant 0 : i32
    %c0_i32_0 = arith.constant 0 : i32
    %c0_i32_1 = arith.constant 0 : i32
    return %c0_i32, %c0_i32_0 : i32, i32
  }
  func.func @transform_2(%arg0: i32) -> (i32, i32) {
    %c0_i32 = arith.constant 0 : i32
    %c0_i32_0 = arith.constant 0 : i32
    %c0_i32_1 = arith.constant 0 : i32
    return %c0_i32, %c0_i32_0 : i32, i32
  }
  func.func @transform_3(%arg0: i32) -> (i32, i32) {
    %c0_i32 = arith.constant 0 : i32
    %c0_i32_0 = arith.constant 0 : i32
    %c0_i32_1 = arith.constant 0 : i32
    return %c0_i32, %c0_i32_0 : i32, i32
  }
  func.func @transform_4(%arg0: i32) -> (i32, i32) {
    %c0_i32 = arith.constant 0 : i32
    %c0_i32_0 = arith.constant 0 : i32
    %c0_i32_1 = arith.constant 0 : i32
    return %c0_i32, %c0_i32_0 : i32, i32
  }
  func.func @transform_5(%arg0: i32) -> (i32, i32) {
    %c0_i32 = arith.constant 0 : i32
    %c0_i32_0 = arith.constant 0 : i32
    %c0_i32_1 = arith.constant 0 : i32
    return %c0_i32, %c0_i32_0 : i32, i32
  }
  func.func @transform_6(%arg0: i32) -> (i32, i32) {
    %c0_i32 = arith.constant 0 : i32
    %c0_i32_0 = arith.constant 0 : i32
    %c0_i32_1 = arith.constant 0 : i32
    return %c0_i32, %c0_i32_0 : i32, i32
  }
  func.func @transform_7(%arg0: i32) -> (i32, i32) {
    %c0_i32 = arith.constant 0 : i32
    %c0_i32_0 = arith.constant 0 : i32
    return %c0_i32, %arg0 : i32, i32
  }
}

</mosaic_0001>

<bundles_post_ra>
// kernel: horno_forward.1
= control target key start
LH: loop header
LB: loop body
LE: loop exit
PB: predicated region body
PF: predicated region fallthrough
CT: control target
= control target key end

     0   :  { %s1275_s0 = inlined_call_operand.vmem [shape: f32[300,16], index: 0, kind: input, shape index: {}]   ;;  %s1276_s1 = inlined_call_operand.vmem [shape: f32[32,16], index: 1, kind: input, shape index: {}]   ;;  %s1277_s2 = inlined_call_operand.vmem [shape: f32[32,1], index: 2, kind: input, shape index: {}]   ;;  %s1278_s3 = inlined_call_operand.vmem [shape: f32[32,32], index: 3, kind: input, shape index: {}]   ;;  %s1279_s4 = inlined_call_operand.vmem [shape: f32[32,1], index: 4, kind: input, shape index: {}]   ;;  %s1280_s5 = inlined_call_operand.vmem [shape: f32[32,1], index: 5, kind: input, shape index: {}]   ;;  %s1281_s6 = inlined_call_operand.<no memory space> [shape: f32[1,1], index: 6, kind: input, shape index: {}]   ;;  %s1282_s7 = inlined_call_operand.hbm [shape: f32[1,300], index: 7, kind: output, shape index: {}]  }
   0x1   :  { %12 = sst [smem:[#allocation2]] %s1281_s6 }
   0x2   :  { %13 = vsyncpa [#allocation4], 0 }
   0x3   :  { %15 = vsyncpa [#allocation4 + $0x1], 0  ;;  %s1052_s26 = smov 0   ;;  %s1054_s27 = smov 0  }
   0x4   :  { %s1056_s28 = smov 0   ;;  %s1058_s29 = smov 0  }
   0x5 LB: > { %s731_s6 = sadd.s32 4294967295, %s1005_s29   ;;  %s732_s30 = sadd.s32 4294967294, %s1005_s29   ;;  %s1005_s29 = sphi %s1058_s29, %s1290_s29   ;;  %s1001_s28 = sphi %s1056_s28, %s1289_s28   ;;  %s997_s27 = sphi %s1054_s27, %s1288_s27   ;;  %s993_s26 = sphi %s1052_s26, %s1287_s26  }
   0x6   : > { %s1075_s8 = sadd.s32 1, %s1005_s29   ;;  %s180_s9 = sadd.s32 1, %s1001_s28 }
   0x7   : > { %s177_s10 = ssub.s32 %s1005_s29, %s1075_s8  ;;  %p190_p0 = scmp.ne.s32.totalorder %s1001_s28, %s997_s27 }
   0x8   : > { %p178_p1 = scmp.eq.s32.totalorder %s177_s10, 0  ;;  %p191_p2 = scmp.eq.s32.totalorder %s731_s6, 2 }
   0x9   : > { %p196_p3 = scmp.ne.s32.totalorder %s997_s27, %s993_s26  ;;  %p197_p4 = scmp.eq.s32.totalorder %s732_s30, 2 }
   0xa   : > { %s1085_s11 = scalar_select %p178_p1, %s1001_s28, %s180_s9  }
   0xb   : > { %p1087_p5 = por %p191_p2, %p190_p0  ;;  %p1091_p6 = por %p197_p4, %p196_p3 }
   0xc   : > { %p735_p7 = scmp.ge.s32.totalorder %s1005_s29, 1  ;;  %p250_p8 = scmp.lt.s32.totalorder %s1005_s29, 4 }
   0xe   : > { %p251_p9 = pnand %p735_p7, %p250_p8 }
   0xf   : > { %s1097_s14 = sshll.u32 (!%p251_p9), %s731_s6, 4  ;;  %vm356_vm0 = vcmask (!%p251_p9), 130048   ;;  %v299_v0 = vld [vmem:[%s1276_s1] sm:$0xff] (!%p251_p9)  ;;  %v1007_v1 = vmov (!%p251_p9), 0   ;;  %v305_v3 = vld [vmem:[%s1277_s2 + $0x10] sm:$0xff] (!%p251_p9)  ;;  %v304_v4 = vld [vmem:[%s1277_s2 + $0x8] sm:$0xff] (!%p251_p9) }
  0x10   : > { %254 = sbr.rel (%p251_p9) target bundleno = 576 (0x240), region = 48  ;;  %p290_p10 = scmp.lt.s32.totalorder (!%p251_p9), %s1097_s14, 37  ;;  %825 = vmatprep.mubr.msk.f32.mxu0 (!%p251_p9), %vm356_vm0, %v299_v0  ;;  %941 = vset.pattern.permute.xlu0 (!%p251_p9), %v1007_v1  ;;  %v303_v2 = vld [vmem:[%s1277_s2] sm:$0xff] (!%p251_p9)  ;;  %v306_v5 = vld [vmem:[%s1277_s2 + $0x18] sm:$0xff] (!%p251_p9)  ;;  %vm1124_vm1 = vmpackc.low (!%p251_p9), %vm356_vm0, %vm356_vm0  ;;  %vm526_vm2 = vcmask (!%p251_p9), 261120  }
  0x11   : > { %338 = vperm.xlu0 (!%p251_p9), %941, %v303_v2   ;;  %942 = vset.pattern.permute.xlu1 (!%p251_p9), %v1007_v1  ;;  %v311_v7 = vld [vmem:[%s1279_s4] sm:$0xff] (!%p251_p9)  ;;  %v312_v13 = vld [vmem:[%s1279_s4 + $0x8] sm:$0xff] (!%p251_p9)  ;;  %v313_v15 = vld [vmem:[%s1279_s4 + $0x10] sm:$0xff] (!%p251_p9)  ;;  %s319_s16 = sld [smem:[#allocation2]] (!%p251_p9)  ;;  %s283_s17 = sand.u32 (!%p251_p9), 1, %s997_s27  }
  0x12   : > { %348 = vperm.xlu1 (!%p251_p9), %942, %v305_v3   ;;  %v314_v16 = vld [vmem:[%s1279_s4 + $0x18] sm:$0xff] (!%p251_p9)  ;;  %v315_v19 = vld [vmem:[%s1280_s5] sm:$0xff] (!%p251_p9)  ;;  %v316_v21 = vld [vmem:[%s1280_s5 + $0x8] sm:$0xff] (!%p251_p9)  ;;  %s284_s18 = scalar_lea.vmem (!%p251_p9), [#allocation3], %s283_s17  ;;  %s665_s22 = scalar_lea.sflag (!%p251_p9), [#allocation4], %s283_s17 }
  0x13   : > { %v317_v22 = vld [vmem:[%s1280_s5 + $0x10] sm:$0xff] (!%p251_p9)  ;;  %v318_v23 = vld [vmem:[%s1280_s5 + $0x18] sm:$0xff] (!%p251_p9)  ;;  %v300_v39 = vld [vmem:[%s1276_s1 + $0x8] sm:$0xff] (!%p251_p9)  ;;  %s677_s19 = sshll.u32 (!%p251_p9), %s284_s18, 4  ;;  %s1008_s24 = smov (!%p251_p9), [#allocation3]   ;;  %s1235_s19 = int_to_ptr.vmem [resolvable:$true] %s677_s19 }
  0x14   : > { %v301_v40 = vld [vmem:[%s1276_s1 + $0x10] sm:$0xff] (!%p251_p9)  ;;  %v302_v41 = vld [vmem:[%s1276_s1 + $0x18] sm:$0xff] (!%p251_p9)  ;;  %v307_v42 = vld [vmem:[%s1278_s3] sm:$0xff] (!%p251_p9)  ;;  %s943_s23 = scalar_lea.vmem (!%p251_p9), %s1235_s19, 16  ;;  %s947_s25 = sshll.u32 (!%p251_p9), %s1008_s24, 4  ;;  %s948_s25 = int_to_ptr.vmem [resolvable:$false] %s947_s25 }
  0x15   : > { %343 = vperm.xlu0 (!%p251_p9), %941, %v304_v4   ;;  %839 = vmatprep.mubr.msk.f32.mxu1 (!%p251_p9), %vm526_vm2, %v307_v42  ;;  %v308_v61 = vld [vmem:[%s1278_s3 + $0x8] sm:$0xff] (!%p251_p9)  ;;  %v309_v62 = vld [vmem:[%s1278_s3 + $0x10] sm:$0xff] (!%p251_p9)  ;;  %v310_v63 = vld [vmem:[%s1278_s3 + $0x18] sm:$0xff] (!%p251_p9)  ;;  %p944_p11 = scmp.ne.s32.totalorder (!%p251_p9), %s1235_s19, %s943_s23  ;;  %p950_p0 = scmp.lt.s32.totalorder (!%p251_p9), %s1235_s19, %s948_s25 }
  0x16   : > { %353 = vperm.xlu1 (!%p251_p9), %942, %v306_v5  }
  0x17   : > { %s291_s21 = scalar_select %p290_p10, %s1097_s14, 37 }
  0x18   : > { %p945_p12 = pnand %p944_p11, %p1087_p5 }
  0x19   : > { %s737_s6 = sshll.u32 %s291_s21, 3  ;;  %508 = vperm.xlu0 %941, %v311_v7   ;;  %s1233_s21 = scalar_lea.hbm %s1282_s7, %s1097_s14 }
  0x1a   : > { %s1120_s10 = scalar_lea.vmem %s1275_s0, %s737_s6  ;;  %513 = vperm.xlu1 %942, %v312_v13   ;;  %p946_p13 = pneg %p945_p12 }
  0x1b   : > { %v320_v8 = vld [vmem:[%s1120_s10] sm:$0xff]  ;;  %v321_v9 = vld [vmem:[%s1120_s10 + $0x8] sm:$0xff]  ;;  %v322_v10 = vld [vmem:[%s1120_s10 + $0x10] sm:$0xff]  ;;  %s949_s6 = scalar_lea.vmem %s948_s25, 32 }
  0x1c   : > { %v845_v11 = vpack.c.bf16 %v321_v9, %v320_v8  ;;  %v323_v12 = vld [vmem:[%s1120_s10 + $0x18] sm:$0xff]  ;;  %v324_v17 = vld [vmem:[%s1120_s10 + $0x20] sm:$0xff]  ;;  %v325_v18 = vld [vmem:[%s1120_s10 + $0x28] sm:$0xff]  ;;  %p951_p1 = scmp.lt.s32.totalorder %s949_s6, %s943_s23 }
  0x1d   : > { %v851_v14 = vpack.c.bf16 %v323_v12, %v322_v10  ;;  %518 = vperm.xlu0 %941, %v313_v15   ;;  %v857_v20 = vpack.c.bf16 %v325_v18, %v324_v17  ;;  %v326_v24 = vld [vmem:[%s1120_s10 + $0x30] sm:$0xff]  ;;  %v327_v25 = vld [vmem:[%s1120_s10 + $0x38] sm:$0xff]  ;;  %v328_v27 = vld [vmem:[%s1120_s10 + $0x40] sm:$0xff] }
  0x1e   : > { %847 = vmatprep.subr.msk.bf16.mxu0 %vm1124_vm1, %v845_v11  ;;  %523 = vperm.xlu1 %942, %v314_v16   ;;  %v863_v26 = vpack.c.bf16 %v327_v25, %v326_v24  ;;  %v329_v28 = vld [vmem:[%s1120_s10 + $0x48] sm:$0xff]  ;;  %v330_v30 = vld [vmem:[%s1120_s10 + $0x50] sm:$0xff]  ;;  %v331_v31 = vld [vmem:[%s1120_s10 + $0x58] sm:$0xff]  ;;  %p952_p2 = por %p951_p1, %p950_p0 }
  0x1f   : > { %850 = vmatpush3.bf16.xpose.msk.msra.mxu0 %vm1124_vm1, %v845_v11  ;;  %v869_v29 = vpack.c.bf16 %v329_v28, %v328_v27  ;;  %v875_v32 = vpack.c.bf16 %v331_v31, %v330_v30  ;;  %v332_v33 = vld [vmem:[%s1120_s10 + $0x60] sm:$0xff]  ;;  %v333_v34 = vld [vmem:[%s1120_s10 + $0x68] sm:$0xff]  ;;  %v334_v36 = vld [vmem:[%s1120_s10 + $0x70] sm:$0xff] }
  0x20   : > { %853 = vmatprep.subr.msk.bf16.mxu0 %vm1124_vm1, %v851_v14  ;;  %v881_v35 = vpack.c.bf16 %v333_v34, %v332_v33  ;;  %v335_v37 = vld [vmem:[%s1120_s10 + $0x78] sm:$0xff]  ;;  %p953_p3 = pnand %p952_p2, %p946_p13 }
  0x21   : > { %630 = vperm.xlu0 %941, %v315_v19   ;;  %v887_v38 = vpack.c.bf16 %v335_v37, %v334_v36 }
  0x22   : > { %635 = vperm.xlu1 %942, %v316_v21  }
  0x25   : > { %640 = vperm.xlu0 %941, %v317_v22  }
  0x26   : > { %645 = vperm.xlu1 %942, %v318_v23  }
  0x27   : > { %856 = vmatpush3.bf16.xpose.msk.msra.mxu0 %vm1124_vm1, %v851_v14 }
  0x28   : > { %859 = vmatprep.subr.msk.bf16.mxu0 %vm1124_vm1, %v857_v20 }
  0x2f   : > { %862 = vmatpush3.bf16.xpose.msk.msra.mxu0 %vm1124_vm1, %v857_v20 }
  0x30   : > { %865 = vmatprep.subr.msk.bf16.mxu0 %vm1124_vm1, %v863_v26 }
  0x37   : > { %868 = vmatpush3.bf16.xpose.msk.msra.mxu0 %vm1124_vm1, %v863_v26 }
  0x38   : > { %871 = vmatprep.subr.msk.bf16.mxu0 %vm1124_vm1, %v869_v29 }
  0x3f   : > { %874 = vmatpush3.bf16.xpose.msk.msra.mxu0 %vm1124_vm1, %v869_v29 }
  0x40   : > { %877 = vmatprep.subr.msk.bf16.mxu0 %vm1124_vm1, %v875_v32 }
  0x47   : > { %880 = vmatpush3.bf16.xpose.msk.msra.mxu0 %vm1124_vm1, %v875_v32  ;;  %v661_v32 = vstv %s319_s16 }
  0x48   : > { %883 = vmatprep.subr.msk.bf16.mxu0 %vm1124_vm1, %v881_v35 }
  0x4f   : > { %886 = vmatpush3.bf16.xpose.msk.msra.mxu0 %vm1124_vm1, %v881_v35 }
  0x50   : > { %889 = vmatprep.subr.msk.bf16.mxu0 %vm1124_vm1, %v887_v38 }
  0x57   : > { %892 = vmatpush3.bf16.xpose.msk.msra.mxu0 %vm1124_vm1, %v887_v38 }
  0x5e   : > { %826 = vmatmul.mubr.msk.f32.vlgmr.msra.gmra.mrb[0].mxu0 %vm356_vm0, %v300_v39 }
  0x5f   : > { %828 = vmatprep.mubr.msk.f32.mxu0 %vm356_vm0, %v301_v40 }
  0x62   : > { %829 = vmatmul.mubr.msk.f32.gmra.mrb[2].mxu0 %vm356_vm0, %v302_v41 }
  0x90   : > { %v339_v43 = vpop.permute.xlu0 %338 }
  0x91   : > { %v349_v44 = vpop.permute.xlu1 %348 }
  0x94   : > { %v344_v45 = vpop.permute.xlu0 %343 }
  0x95   : > { %v354_v51 = vpop.permute.xlu1 %353 }
  0x98   : > { %v509_v0 = vpop.permute.xlu0 %508 }
  0x99   : > { %v514_v1 = vpop.permute.xlu1 %513 }
  0x9c   : > { %v519_v2 = vpop.permute.xlu0 %518 }
  0x9d   : > { %v524_v3 = vpop.permute.xlu1 %523 }
  0xa0   : > { %v631_v8 = vpop.permute.xlu0 %630 }
  0xa1   : > { %v636_v10 = vpop.permute.xlu1 %635 }
  0xa4   : > { %v641_v21 = vpop.permute.xlu0 %640 }
  0xa5   : > { %v646_v23 = vpop.permute.xlu1 %645 }
 0x131   : > { %v827_v46 = vpop.f32.mrb[0].mxu0 }
 0x132   : > { %v489_v47 = vadd.f32 %v827_v46, %v344_v45  ;;  %v483_v48 = vpop.f32.mrb[1].mxu0 }
 0x133   : > { %v484_v49 = vadd.f32 %v483_v48, %v339_v43 }
 0x134   : > { %v503_v50 = vmax.f32 %v489_v47, 0.0 }
 0x135   : > { %v502_v52 = vmax.f32 %v484_v49, 0.0  ;;  %v830_v53 = vpop.f32.mrb[2].mxu0 }
 0x136   : > { %v499_v54 = vadd.f32 %v830_v53, %v354_v51  ;;  %v493_v55 = vpop.f32.mrb[3].mxu0 }
 0x137   : > { %v494_v56 = vadd.f32 %v493_v55, %v349_v44  ;;  %v893_v57 = vpack.c.bf16 %v503_v50, %v502_v52 }
 0x138   : > { %v505_v58 = vmax.f32 %v499_v54, 0.0 }
 0x139   : > { %v504_v59 = vmax.f32 %v494_v56, 0.0  ;;  %894 = vmatprep.subr.bf16.mxu1 %v893_v57 }
 0x13a   : > { %896 = vmatpush3.bf16.msra.mxu1 %v893_v57 }
 0x13b   : > { %v897_v60 = vpack.c.bf16 %v505_v58, %v504_v59 }
 0x13d   : > { %898 = vmatprep.subr.bf16.mxu1 %v897_v60 }
 0x13e   : > { %900 = vmatpush3.bf16.msra.mxu1 %v897_v60 }
 0x141   : > { %840 = vmatmul.mubr.msk.f32.vlgmr.msra.gmra.mrb[0].mxu1 %vm526_vm2, %v308_v61 }
 0x142   : > { %842 = vmatprep.mubr.msk.f32.mxu1 %vm526_vm2, %v309_v62 }
 0x145   : > { %843 = vmatmul.mubr.msk.f32.gmra.mrb[2].mxu1 %vm526_vm2, %v310_v63 }
 0x214   : > { %v841_v4 = vpop.f32.mrb[0].mxu1 }
 0x215   : > { %v611_v5 = vadd.f32 %v841_v4, %v514_v1  ;;  %v605_v6 = vpop.f32.mrb[1].mxu1 }
 0x216   : > { %v606_v7 = vadd.f32 %v605_v6, %v509_v0 }
 0x217   : > { %v625_v9 = vmax.f32 %v611_v5, 0.0 }
 0x218   : > { %v624_v11 = vmax.f32 %v606_v7, 0.0  ;;  %v844_v12 = vpop.f32.mrb[2].mxu1 }
 0x219   : > { %v649_v13 = vmul.f32 %v636_v10, %v625_v9  ;;  %v621_v14 = vadd.f32 %v844_v12, %v524_v3  ;;  %v615_v15 = vpop.f32.mrb[3].mxu1 }
 0x21a   : > { %v648_v16 = vmul.f32 %v631_v8, %v624_v11  ;;  %v616_v17 = vadd.f32 %v615_v15, %v519_v2 }
 0x21b   : > { %v627_v19 = vmax.f32 %v621_v14, 0.0 }
 0x21c   : > { %v652_v18 = vadd.f32 %v649_v13, %v648_v16  ;;  %v626_v20 = vmax.f32 %v616_v17, 0.0 }
 0x21d   : > { %v651_v24 = vmul.f32 %v646_v23, %v627_v19 }
 0x21e   : > { %v650_v22 = vmul.f32 %v641_v21, %v626_v20 }
 0x220   : > { %v653_v25 = vadd.f32 %v652_v18, %v650_v22 }
 0x222   : > { %v654_v26 = vadd.f32 %v653_v25, %v651_v24 }
 0x224   : > { %v655_v27 = vrot.slane %v654_v26, 4 }
 0x226   : > { %v656_v28 = vadd.f32 %v655_v27, %v654_v26 }
 0x228   : > { %v657_v29 = vrot.slane %v656_v28, 2 }
 0x22a   : > { %v658_v30 = vadd.f32 %v657_v29, %v656_v28 }
 0x22c   : > { %v659_v31 = vrot.slane %v658_v30, 1 }
 0x22e   : > { %v660_v33 = vadd.f32 %v659_v31, %v658_v30 }
 0x230   : > { %v662_v34 = vadd.f32 %v661_v32, %v660_v33 }
 0x232   : > { %663 = vst [vmem:[%s284_s18] sm:$0x1] %v662_v34 }
 0x233   : > { %956 = shalt.err (!%p953_p3)
}
 0x234   : > { %s957_s14 = scalar_lea.hbm %s1233_s21, 16  ;;  %s961_s15 = scalar_lea.hbm %s1282_s7, 48 }
 0x235   : > { %p958_p4 = scmp.ne.s32.totalorder %s1233_s21, %s957_s14  ;;  %p962_p9 = scmp.lt.u32.totalorder %s1233_s21, %s1282_s7 }
 0x236   : > { %p963_p10 = scmp.lt.u32.totalorder %s961_s15, %s957_s14  ;;  %p965_p12 = scmp.lt.u32.totalorder %s957_s14, %s1233_s21 }
 0x237   : > { %p959_p7 = pnand %p958_p4, %p1087_p5 }
 0x238   : > { %p964_p11 = por %p963_p10, %p962_p9 }
 0x239   : > { %p960_p8 = pneg %p959_p7 }
 0x23a   : > { %p966_p13 = por %p965_p12, %p964_p11 }
 0x23c   : > { %p967_p0 = pnand %p966_p13, %p960_p8 }
 0x23e   : > { %970 = shalt.err (!%p967_p0)
}
 0x23f   : > { %901 = dma.vmem_to_hbm [thread:$0]  (%p1087_p5), %s1235_s19, 16, %s1233_s21, %s665_s22  }
 0x240 PF: > { %p907_p1 = scmp.ge.s32.totalorder %s1005_s29, 2  ;;  %s689_s18 = sand.u32 1, %s993_s26  }
 0x241   : > { %s690_s20 = scalar_lea.sflag [#allocation4], %s689_s18 }
 0x242   : > { %p904_p2 = pnand %p907_p1, %p1091_p6 }
 0x244   : > { %988 = dma.done.wait (!%p904_p2), %s690_s20, 16  }
 0x245   : > { %990 = vsyncadd (!%p904_p2), %s690_s20, 4294967280  ;;  %p18_p3 = scmp.ge.s32.totalorder %s1075_s8, 5   ;;  %s1287_s26 = smov %s997_s27 }
 0x246   : > { %s1288_s27 = smov %s1001_s28  ;;  %s1289_s28 = smov %s1085_s11 }
 0x247   : > { %s1290_s29 = smov %s1075_s8  ;;  %20 = sbr.rel (!%p18_p3) target bundleno = 5 (0x5), region = 83 }
 0x24e   :  { %694 = vsyncpa [#allocation4], 1 }
 0x24f   :  { %696 = vsyncpa [#allocation4 + $0x1], 1 }

</bundles_post_ra>
